<compile_context>
chip_gen: v5e
topology: v5e:2x2
jax: 0.10.0
libtpu: 0.0.40
codegen_flags: <defaults>
</compile_context>

<pallas_src>
import jax
import jax.numpy as jnp
from jax.experimental import pallas as pl
from jax.experimental.pallas import tpu as pltpu


def ffn_kernel(x_ref, w1_ref, b1_ref, w2_ref, b2_ref, o_ref, acc_ref):
    k = pl.program_id(1)

    @pl.when(k == 0)
    def _init():
        acc_ref[...] = jnp.zeros_like(acc_ref)

    # fc1 chunk: (tm, E) @ (E, th) -> (tm, th), bias + ReLU in f32.
    h = jnp.dot(x_ref[...], w1_ref[...], preferred_element_type=jnp.float32)
    h = jnp.maximum(h + b1_ref[...], 0.0)

    # fc2 chunk: (tm, th) @ (th, E) accumulated into the f32 scratch.
    acc_ref[...] += jnp.dot(h.astype(w2_ref.dtype), w2_ref[...],
                            preferred_element_type=jnp.float32)

    @pl.when(k == pl.num_programs(1) - 1)
    def _finalize():
        o_ref[...] = (acc_ref[...] + b2_ref[...]).astype(o_ref.dtype)


def feed_forward_network(x, w1, b1, w2, b2, *, tm=None, th=None,
                         compute_dtype=None):
    """x: (..., E).  w1: (E, H), b1: (H,), w2: (H, E), b2: (E,)."""
    orig_shape = x.shape
    E = orig_shape[-1]
    H = w1.shape[1]
    out_dtype = x.dtype

    x2d = x.reshape(-1, E)
    M = x2d.shape[0]

    if compute_dtype is not None:
        x2d = x2d.astype(compute_dtype)
        w1 = w1.astype(compute_dtype)
        w2 = w2.astype(compute_dtype)
    cdtype = x2d.dtype
    itemsize = jnp.dtype(cdtype).itemsize
    out_itemsize = jnp.dtype(out_dtype).itemsize

    # Biases kept in f32 (accurate add into the f32 accumulator path).
    b1_2d = b1.astype(jnp.float32).reshape(1, H)
    b2_2d = b2.astype(jnp.float32).reshape(1, E)

    # ---- tile selection -------------------------------------------------
    sub_align = 16 if itemsize == 2 else 8   # sublane packing (bf16 vs f32)

    if tm is None:
        tm_cap = 256
        if M <= tm_cap:
            tm = M                            # full dim: always a legal block
        else:
            tm = (tm_cap // sub_align) * sub_align

    if th is None:
        if H <= 512 or H % 128 != 0:
            th = H                            # full dim: always legal
        else:
            th = 128
            for cand in (512, 384, 256, 128):  # multiple of 128 that divides H
                if cand <= H and H % cand == 0:
                    th = cand
                    break

    def vmem_need(tm_, th_):
        return (2 * tm_ * E * itemsize        # x tiles (double-buffered)
                + 2 * E * th_ * itemsize      # W1 tiles
                + 2 * th_ * 4                 # b1 tiles (f32)
                + 2 * th_ * E * itemsize      # W2 tiles
                + 2 * E * 4                   # b2
                + 2 * tm_ * E * out_itemsize  # output tiles
                + tm_ * E * 4)                # f32 accumulator scratch

    # Conservative budget that fits v5e/v6e/v7x scoped VMEM.
    budget = 24 * (1 << 20)
    while vmem_need(tm, th) > budget and th > 128 and th % 256 == 0:
        th //= 2
    while vmem_need(tm, th) > budget and tm % (2 * sub_align) == 0 and tm > 2 * sub_align:
        tm //= 2

    grid = (pl.cdiv(M, tm), pl.cdiv(H, th))

    # Advisory cost estimate for the XLA scheduler.
    flops = 4 * M * E * H                     # two (M,E,H) matmuls, 2 flops/MAC
    bytes_accessed = ((M * E) * itemsize      # x
                      + 2 * (E * H) * itemsize  # W1 + W2
                      + (H + E) * 4             # biases
                      + (M * E) * out_itemsize)  # output
    cost = pl.CostEstimate(flops=flops, transcendentals=0,
                           bytes_accessed=bytes_accessed)

    vmem_limit = max(16 * (1 << 20),
                     min(int(vmem_need(tm, th) * 1.5) + (1 << 20),
                         56 * (1 << 20)))

    out = pl.pallas_call(
        ffn_kernel,
        out_shape=jax.ShapeDtypeStruct((M, E), out_dtype),
        grid_spec=pltpu.PrefetchScalarGridSpec(
            num_scalar_prefetch=0,
            grid=grid,
            in_specs=[
                pl.BlockSpec((tm, E), lambda i, k: (i, 0)),   # x tile
                pl.BlockSpec((E, th), lambda i, k: (0, k)),   # W1 chunk
                pl.BlockSpec((1, th), lambda i, k: (0, k)),   # b1 chunk
                pl.BlockSpec((th, E), lambda i, k: (k, 0)),   # W2 chunk
                pl.BlockSpec((1, E), lambda i, k: (0, 0)),    # b2
            ],
            out_specs=pl.BlockSpec((tm, E), lambda i, k: (i, 0)),
            scratch_shapes=[pltpu.VMEM((tm, E), jnp.float32)],
        ),
        compiler_params=pltpu.CompilerParams(
            dimension_semantics=("parallel", "arbitrary"),
            vmem_limit_bytes=vmem_limit),
        cost_estimate=cost,
    )(x2d, w1, b1_2d, w2, b2_2d)

    return out.reshape(orig_shape)


def init_params(key, embed_dim, dtype=jnp.float32):
    """Deterministic init mirroring nn.Linear defaults (uniform +-1/sqrt(fan_in))."""
    hidden_dim = 4 * embed_dim
    k1, k2, k3, k4 = jax.random.split(key, 4)
    bound1 = 1.0 / (embed_dim ** 0.5)
    bound2 = 1.0 / (hidden_dim ** 0.5)
    # Stored transposed relative to PyTorch's (out_features, in_features).
    w1 = jax.random.uniform(k1, (embed_dim, hidden_dim), dtype, -bound1, bound1)
    b1 = jax.random.uniform(k2, (hidden_dim,), dtype, -bound1, bound1)
    w2 = jax.random.uniform(k3, (hidden_dim, embed_dim), dtype, -bound2, bound2)
    b2 = jax.random.uniform(k4, (embed_dim,), dtype, -bound2, bound2)
    return w1, b1, w2, b2


if __name__ == "__main__":
    key = jax.random.PRNGKey(0)
    kx, kp = jax.random.split(key)

    # Small but lane-dense shapes: E=128 (1 full lane tile), H=512.
    batch, seq, embed_dim = 2, 8, 128
    x = jax.random.normal(kx, (batch, seq, embed_dim), jnp.float32)
    w1, b1, w2, b2 = init_params(kp, embed_dim)

    # th=128 forces a 4-step hidden-dim reduction so the accumulator /
    # pl.when init+finalize path is exercised even at this small size.
    out = feed_forward_network(x, w1, b1, w2, b2, th=128)
    out = jax.block_until_ready(out)

    # Pure-JAX reference check.
    ref = jnp.maximum(x @ w1 + b1, 0.0) @ w2 + b2
    assert out.shape == x.shape
    assert jnp.allclose(out, ref, atol=1e-4, rtol=1e-4), \
        float(jnp.max(jnp.abs(out - ref)))

    print("KERNEL_OK")
</pallas_src>

<mosaic_0001>
module attributes {stable_mosaic.version = 11 : i64} {
  func.func @ffn_kernel(%arg0: i32, %arg1: i32, %arg2: memref<16x128xf32, #tpu.memory_space<vmem>>, %arg3: memref<128x128xf32, #tpu.memory_space<vmem>>, %arg4: memref<1x128xf32, #tpu.memory_space<vmem>>, %arg5: memref<128x128xf32, #tpu.memory_space<vmem>>, %arg6: memref<1x128xf32, #tpu.memory_space<vmem>>, %arg7: memref<16x128xf32, #tpu.memory_space<vmem>>, %arg8: memref<16x128xf32, #tpu.memory_space<vmem>>) attributes {dimension_semantics = [#tpu.dimension_semantics<parallel>, #tpu.dimension_semantics<arbitrary>], iteration_bounds = array<i64: 1, 4>, scalar_prefetch = 0 : i64, scratch_operands = 1 : i64, tpu.core_type = #tpu.core_type<tc>, window_params = [{transform_indices = @transform_0, window_bounds = array<i64: 16, 128>}, {transform_indices = @transform_1, window_bounds = array<i64: 128, 128>}, {transform_indices = @transform_2, window_bounds = array<i64: 1, 128>}, {transform_indices = @transform_3, window_bounds = array<i64: 128, 128>}, {pipeline_mode = #tpu.pipeline_mode<synchronous>, transform_indices = @transform_4, window_bounds = array<i64: 1, 128>}, {transform_indices = @transform_5, window_bounds = array<i64: 16, 128>}]} {
    %c0_i32 = arith.constant 0 : i32
    %0 = arith.cmpi eq, %arg1, %c0_i32 : i32
    %1 = arith.extui %0 : i1 to i32
    %c0_i32_0 = arith.constant 0 : i32
    %2 = arith.cmpi ne, %1, %c0_i32_0 : i32
    scf.if %2 {
      %cst_15 = arith.constant 0.000000e+00 : f32
      %19 = vector.broadcast %cst_15 : f32 to vector<16x128xf32>
      %c0_16 = arith.constant 0 : index
      %c0_17 = arith.constant 0 : index
      %20 = vector.load %arg8[%c0_16, %c0_17] : memref<16x128xf32, #tpu.memory_space<vmem>>, vector<16x128xf32>
      tpu.vector_store %arg8[%c0_16, %c0_17], %19 {strides = array<i32>} : memref<16x128xf32, #tpu.memory_space<vmem>>, vector<16x128xf32>,
    } else {
    }
    %c0 = arith.constant 0 : index
    %c0_1 = arith.constant 0 : index
    %3 = vector.load %arg2[%c0, %c0_1] : memref<16x128xf32, #tpu.memory_space<vmem>>, vector<16x128xf32>
    %c0_2 = arith.constant 0 : index
    %c0_3 = arith.constant 0 : index
    %4 = vector.load %arg3[%c0_2, %c0_3] : memref<128x128xf32, #tpu.memory_space<vmem>>, vector<128x128xf32>
    %cst = arith.constant dense<0.000000e+00> : vector<16x128xf32>
    %5 = tpu.matmul %3, %4, %cst {dimension_numbers = #tpu.dot_dimension_numbers<[1], [0], [0], [1], [0, 0, 1, 1], [], []>} : vector<16x128xf32>, vector<128x128xf32>, vector<16x128xf32> -> vector<16x128xf32>
    %c0_4 = arith.constant 0 : index
    %c0_5 = arith.constant 0 : index
    %6 = vector.load %arg4[%c0_4, %c0_5] : memref<1x128xf32, #tpu.memory_space<vmem>>, vector<1x128xf32>
    %7 = vector.broadcast %6 : vector<1x128xf32> to vector<16x128xf32>
    %8 = arith.addf %5, %7 : vector<16x128xf32>
    %cst_6 = arith.constant 0.000000e+00 : f32
    %9 = vector.broadcast %cst_6 : f32 to vector<16x128xf32>
    %10 = arith.maximumf %8, %9 : vector<16x128xf32>
    %c0_7 = arith.constant 0 : index
    %c0_8 = arith.constant 0 : index
    %11 = vector.load %arg8[%c0_7, %c0_8] : memref<16x128xf32, #tpu.memory_space<vmem>>, vector<16x128xf32>
    %c0_9 = arith.constant 0 : index
    %c0_10 = arith.constant 0 : index
    %12 = vector.load %arg5[%c0_9, %c0_10] : memref<128x128xf32, #tpu.memory_space<vmem>>, vector<128x128xf32>
    %cst_11 = arith.constant dense<0.000000e+00> : vector<16x128xf32>
    %13 = tpu.matmul %10, %12, %cst_11 {dimension_numbers = #tpu.dot_dimension_numbers<[1], [0], [0], [1], [0, 0, 1, 1], [], []>} : vector<16x128xf32>, vector<128x128xf32>, vector<16x128xf32> -> vector<16x128xf32>
    %14 = arith.addf %11, %13 : vector<16x128xf32>
    %c0_12 = arith.constant 0 : index
    %c0_13 = arith.constant 0 : index
    %15 = vector.load %arg8[%c0_12, %c0_13] : memref<16x128xf32, #tpu.memory_space<vmem>>, vector<16x128xf32>
    tpu.vector_store %arg8[%c0_12, %c0_13], %14 {strides = array<i32>} : memref<16x128xf32, #tpu.memory_space<vmem>>, vector<16x128xf32>,
    %c3_i32 = arith.constant 3 : i32
    %16 = arith.cmpi eq, %arg1, %c3_i32 : i32
    %17 = arith.extui %16 : i1 to i32
    %c0_i32_14 = arith.constant 0 : i32
    %18 = arith.cmpi ne, %17, %c0_i32_14 : i32
    scf.if %18 {
      %c0_15 = arith.constant 0 : index
      %c0_16 = arith.constant 0 : index
      %19 = vector.load %arg8[%c0_15, %c0_16] : memref<16x128xf32, #tpu.memory_space<vmem>>, vector<16x128xf32>
      %c0_17 = arith.constant 0 : index
      %c0_18 = arith.constant 0 : index
      %20 = vector.load %arg6[%c0_17, %c0_18] : memref<1x128xf32, #tpu.memory_space<vmem>>, vector<1x128xf32>
      %21 = vector.broadcast %20 : vector<1x128xf32> to vector<16x128xf32>
      %22 = arith.addf %19, %21 : vector<16x128xf32>
      %c0_19 = arith.constant 0 : index
      %c0_20 = arith.constant 0 : index
      %23 = vector.load %arg7[%c0_19, %c0_20] : memref<16x128xf32, #tpu.memory_space<vmem>>, vector<16x128xf32>
      tpu.vector_store %arg7[%c0_19, %c0_20], %22 {strides = array<i32>} : memref<16x128xf32, #tpu.memory_space<vmem>>, vector<16x128xf32>,
    } else {
    }
    return
  }
  func.func @transform_0(%arg0: i32, %arg1: i32) -> (i32, i32) {
    %c0_i32 = arith.constant 0 : i32
    %c0_i32_0 = arith.constant 0 : i32
    return %arg0, %c0_i32 : i32, i32
  }
  func.func @transform_1(%arg0: i32, %arg1: i32) -> (i32, i32) {
    %c0_i32 = arith.constant 0 : i32
    %c0_i32_0 = arith.constant 0 : i32
    return %c0_i32, %arg1 : i32, i32
  }
  func.func @transform_2(%arg0: i32, %arg1: i32) -> (i32, i32) {
    %c0_i32 = arith.constant 0 : i32
    %c0_i32_0 = arith.constant 0 : i32
    return %c0_i32, %arg1 : i32, i32
  }
  func.func @transform_3(%arg0: i32, %arg1: i32) -> (i32, i32) {
    %c0_i32 = arith.constant 0 : i32
    %c0_i32_0 = arith.constant 0 : i32
    return %arg1, %c0_i32 : i32, i32
  }
  func.func @transform_4(%arg0: i32, %arg1: i32) -> (i32, i32) {
    %c0_i32 = arith.constant 0 : i32
    %c0_i32_0 = arith.constant 0 : i32
    %c0_i32_1 = arith.constant 0 : i32
    return %c0_i32, %c0_i32_0 : i32, i32
  }
  func.func @transform_5(%arg0: i32, %arg1: i32) -> (i32, i32) {
    %c0_i32 = arith.constant 0 : i32
    %c0_i32_0 = arith.constant 0 : i32
    return %arg0, %c0_i32 : i32, i32
  }
}

</mosaic_0001>

<bundles_post_ra>
// kernel: tpu_custom_call.1
= control target key start
LH: loop header
LB: loop body
LE: loop exit
PB: predicated region body
PF: predicated region fallthrough
CT: control target
= control target key end

     0   :  { %s1189_s0 = inlined_call_operand.hbm [shape: f32[16,128], index: 0, kind: input, shape index: {}]   ;;  %s1190_s1 = inlined_call_operand.hbm [shape: f32[128,512], index: 1, kind: input, shape index: {}]   ;;  %s1191_s2 = inlined_call_operand.hbm [shape: f32[1,512], index: 2, kind: input, shape index: {}]   ;;  %s1192_s3 = inlined_call_operand.hbm [shape: f32[512,128], index: 3, kind: input, shape index: {}]   ;;  %s1193_s4 = inlined_call_operand.vmem [shape: f32[1,128], index: 4, kind: input, shape index: {}]   ;;  %s1194_s5 = inlined_call_operand.hbm [shape: f32[16,128], index: 5, kind: output, shape index: {}]  }
   0x1   :  { %1196 = sst [smem:[#allocation17_spill]] %s1189_s0 }
   0x2   :  { %1197 = sst [smem:[#allocation18_spill]] %s1190_s1 }
   0x3   :  { %1198 = sst [smem:[#allocation19_spill]] %s1191_s2 }
   0x4   :  { %10 = vsyncpa [#allocation4], 0 }
   0x5   :  { %11 = vsyncpa [#allocation7], 0 }
   0x6   :  { %13 = vsyncpa [#allocation7 + $0x1], 0 }
   0x7   :  { %14 = vsyncpa [#allocation10], 0 }
   0x8   :  { %16 = vsyncpa [#allocation10 + $0x1], 0 }
   0x9   :  { %17 = vsyncpa [#allocation5], 0  ;;  %s984_s18 = smov 0   ;;  %s986_s19 = smov 0  }
   0xa   :  { %s988_s20 = smov 0   ;;  %s990_s21 = smov 0  }
   0xb   :  { %s992_s22 = smov 0   ;;  %s994_s23 = smov 0  }
   0xc LB: > { %s32_s24 = sadd.s32 1, %s940_s22  ;;  %s68_s25 = sadd.s32 1, %s932_s20  ;;  %s944_s23 = sphi %s994_s23, %s23_s23   ;;  %s940_s22 = sphi %s992_s22, %s1212_s22   ;;  %s936_s21 = sphi %s990_s21, %s1211_s21   ;;  %s932_s20 = sphi %s988_s20, %s1210_s20   ;;  %s928_s19 = sphi %s986_s19, %s1209_s19   ;;  %s924_s18 = sphi %s984_s18, %s1208_s18  }
   0xd   : > { %p33_p0 = scmp.ge.s32.totalorder %s32_s24, 4  ;;  %p75_p1 = scmp.ne.s32.totalorder %s932_s20, %s928_s19 }
   0xe   : > { %p76_p2 = scmp.eq.s32.totalorder %s944_s23, 0  ;;  %p672_p5 = scmp.lt.s32.totalorder %s944_s23, 4 }
   0xf   : > { %s1214_s24 = smov (%p33_p0, %s32_s24), 0  ;;  %s224_s28 = sand.u32 1, %s944_s23  }
  0x10   : > { %1199 = sst [smem:[#allocation16_spill]] %s1214_s24  ;;  %p1021_p3 = por %p76_p2, %p75_p1 }
  0x11   : > { %s65_s27 = ssub.s32 %s940_s22, %s1214_s24  ;;  %s1030_s29 = sand.u32 1, %s932_s20  }
  0x12   : > { %p66_p4 = scmp.eq.s32.totalorder %s65_s27, 0  ;;  %s595_s6 = sshll.u32 %s1030_s29, 7 }
  0x13   : > { %s596_s7 = sshll.u32 %s940_s22, 3  ;;  %s1201_s1 = sld [smem:[#allocation18_spill]] }
  0x14   : > { %s1033_s30 = scalar_select %p66_p4, %s932_s20, %s68_s25  }
  0x15   : > { %s228_s11 = scalar_lea.vmem [#allocation6], %s595_s6  ;;  %p1044_p6 = pnand %p672_p5, %p1021_p3 }
  0x16   : > { %s235_s12 = sshll.u32 %s228_s11, 4  ;;  %s1048_s15 = scalar_lea.sflag [#allocation7], %s224_s28  ;;  %s236_s12 = int_to_ptr.vmem [resolvable:$true] %s235_s12 }
  0x17   : > { %s946_s16 = smov 512   ;;  %s947_s17 = smov 128  }
  0x18   : > { %s948_s25 = smov 8   ;;  %s1056_s27 = sadd.s32 4294967295, %s944_s23  }
  0x19   : > { %s232_s10 = scalar_lea.hbm %s1201_s1, %s596_s7  ;;  %p81_p7 = scmp.ne.s32.totalorder %s928_s19, %s924_s18 }
  0x1a   : > { %s233_s13 = sshll.u32 %s232_s10, 4  ;;  %p82_p8 = scmp.eq.s32.totalorder %s1056_s27, 0  ;;  %s234_s13 = int_to_ptr.hbm [resolvable:$true] %s233_s13 }
  0x1b   : > { %664 = dma.hbm_to_vmem [thread:$0]  (!%p1044_p6), %s234_s13, 2048, %s236_s12, %s1048_s15, %s946_s16, %s947_s17, %s948_s25  }
  0x1c   : > { %p592_p9 = scmp.ge.s32.totalorder %s944_s23, 1  ;;  %p191_p10 = scmp.lt.s32.totalorder %s944_s23, 5 }
  0x1d   : > { %p1065_p11 = por %p82_p8, %p81_p7  ;;  %s1204_s0 = sld [smem:[#allocation17_spill]] }
  0x1e   : > { %p1072_p12 = pnand %p592_p9, %p191_p10  ;;  %s949_s18 = smov [#allocation3]  }
  0x1f   : > { %s207_s10 = sshll.u32 %s949_s18, 4  ;;  %s1206_s2 = sld [smem:[#allocation19_spill]]  ;;  %s208_s10 = int_to_ptr.vmem [resolvable:$true] %s207_s10 }
  0x20   : > { %p657_p13 = pneg %p1072_p12  ;;  %s248_s28 = scalar_lea.vmem [#allocation8], %s1030_s29 }
  0x21   : > { %s255_s7 = sshll.u32 %s248_s28, 4  ;;  %s610_s18 = sshll.u32 %s940_s22, 7  ;;  %s256_s7 = int_to_ptr.vmem [resolvable:$true] %s255_s7 }
  0x22   : > { %p658_p0 = pnand %p657_p13, %p82_p8  ;;  %s263_s24 = scalar_lea.sflag [#allocation10], %s1030_s29 }
  0x23   : > { %s205_s8 = sshll.u32 %s1204_s0, 4  ;;  %s266_s0 = scalar_lea.vmem [#allocation9], %s595_s6  ;;  %s206_s8 = int_to_ptr.hbm [resolvable:$true] %s205_s8 }
  0x24   : > { %660 = dma.hbm_to_vmem [thread:$0]  (!%p658_p0), %s206_s8, 256, %s208_s10, [#allocation4], %s947_s17, %s947_s17, %s948_s25  }
  0x25   : > { %s251_s13 = scalar_lea.hbm %s1206_s2, %s940_s22  ;;  %s274_s11 = sshll.u32 %s266_s0, 4  ;;  %s275_s11 = int_to_ptr.vmem [resolvable:$true] %s274_s11 }
  0x26   : > { %s253_s16 = sshll.u32 %s251_s13, 4  ;;  %s271_s2 = scalar_lea.hbm %s1192_s3, %s610_s18  ;;  %s254_s16 = int_to_ptr.hbm [resolvable:$true] %s253_s16 }
  0x27   : > { %667 = dma.hbm_to_vmem [thread:$0]  (!%p1044_p6), %s254_s16, 16, %s256_s7, %s1048_s15  }
  0x28   : > { %s272_s13 = sshll.u32 %s271_s2, 4  ;;  %286 = sbr.rel (%p1072_p12) target bundleno = 382 (0x17e), region = 40  ;;  %s273_s13 = int_to_ptr.hbm [resolvable:$true] %s272_s13 }
  0x29   : > { %670 = dma.hbm_to_vmem [thread:$0]  (!%p1044_p6), %s273_s13, 2048, %s275_s11, %s263_s24, %s947_s17, %s947_s17, %s948_s25  }
  0x2d   : > { %907 = dma.done.wait (%p82_p8), [#allocation4], 256  }
  0x2e   : > { %909 = vsyncadd (%p82_p8), [#allocation4], 4294967040  ;;  %s293_s0 = sand.u32 1, %s1056_s27   ;;  %s1111_s1 = sand.u32 1, %s928_s19  }
  0x2f   : > { %s602_s2 = sshll.u32 %s1111_s1, 7  ;;  %s294_s29 = scalar_lea.sflag [#allocation7], %s293_s0 }
  0x30   : > { %s1114_s6 = scalar_lea.vmem [#allocation6], %s602_s2 }
  0x31   : > { %911 = dma.done.wait (%p1065_p11), %s294_s29, 2064  }
  0x32   : > { %913 = vsyncadd (%p1065_p11), %s294_s29, 4294965232  ;;  %s306_s24 = scalar_lea.vmem [#allocation8], %s1111_s1  ;;  %s313_s14 = scalar_lea.sflag [#allocation10], %s1111_s1 }
  0x33   : > { %s1122_s15 = scalar_lea.vmem [#allocation9], %s602_s2 }
  0x34   : > { %915 = dma.done.wait (%p1065_p11), %s313_s14, 2048  }
  0x35   : > { %917 = vsyncadd (%p1065_p11), %s313_s14, 4294965248  ;;  %p604_p1 = scmp.ne.s32.totalorder %s936_s21, 0 }
  0x37   : > { %354 = sbr.rel (%p604_p1) target bundleno = 63 (0x3f), region = 60 }
  0x3c   : > { %v950_v0 = vmov 0.0  }
  0x3d   : > { %355 = vst [vmem:[#allocation2] sm:$0xff] %v950_v0 }
  0x3e   : > { %356 = vst [vmem:[#allocation2 + $0x8] sm:$0xff] %v950_v0 }
  0x3f PF: > { %v374_v1 = vld [vmem:[%s1114_s6 + $0x78] sm:$0xff]  ;;  %v373_v2 = vld [vmem:[%s1114_s6 + $0x70] sm:$0xff]  ;;  %v372_v3 = vld [vmem:[%s1114_s6 + $0x68] sm:$0xff]  ;;  %p605_p2 = scmp.ne.s32.totalorder %s936_s21, 3 }
  0x40   : > { %611 = vmatpush.msra.mxu2 %v374_v1  ;;  %379 = vmatpush.msra.mxu0 %v374_v1  ;;  %v371_v4 = vld [vmem:[%s1114_s6 + $0x60] sm:$0xff]  ;;  %v370_v5 = vld [vmem:[%s1114_s6 + $0x58] sm:$0xff]  ;;  %v369_v8 = vld [vmem:[%s1114_s6 + $0x50] sm:$0xff] }
  0x41   : > { %v421_v6 = vld [vmem:[%s1122_s15 + $0x78] sm:$0xff]  ;;  %v420_v7 = vld [vmem:[%s1122_s15 + $0x70] sm:$0xff]  ;;  %v419_v9 = vld [vmem:[%s1122_s15 + $0x68] sm:$0xff] }
  0x42   : > { %612 = vmatpush.msra.mxu2 %v373_v2  ;;  %380 = vmatpush.msra.mxu0 %v373_v2  ;;  %v368_v10 = vld [vmem:[%s1114_s6 + $0x48] sm:$0xff]  ;;  %v367_v12 = vld [vmem:[%s1114_s6 + $0x40] sm:$0xff]  ;;  %v366_v14 = vld [vmem:[%s1114_s6 + $0x38] sm:$0xff] }
  0x43   : > { %627 = vmatpush.msra.mxu3 %v421_v6  ;;  %422 = vmatpush.msra.mxu1 %v421_v6  ;;  %v418_v11 = vld [vmem:[%s1122_s15 + $0x60] sm:$0xff]  ;;  %v417_v13 = vld [vmem:[%s1122_s15 + $0x58] sm:$0xff]  ;;  %v416_v15 = vld [vmem:[%s1122_s15 + $0x50] sm:$0xff] }
  0x44   : > { %613 = vmatpush.msra.mxu2 %v372_v3  ;;  %381 = vmatpush.msra.mxu0 %v372_v3  ;;  %v365_v16 = vld [vmem:[%s1114_s6 + $0x30] sm:$0xff]  ;;  %v364_v18 = vld [vmem:[%s1114_s6 + $0x28] sm:$0xff]  ;;  %v363_v20 = vld [vmem:[%s1114_s6 + $0x20] sm:$0xff] }
  0x45   : > { %628 = vmatpush.msra.mxu3 %v420_v7  ;;  %423 = vmatpush.msra.mxu1 %v420_v7  ;;  %v415_v17 = vld [vmem:[%s1122_s15 + $0x48] sm:$0xff]  ;;  %v414_v19 = vld [vmem:[%s1122_s15 + $0x40] sm:$0xff]  ;;  %v413_v21 = vld [vmem:[%s1122_s15 + $0x38] sm:$0xff] }
  0x46   : > { %614 = vmatpush.msra.mxu2 %v371_v4  ;;  %382 = vmatpush.msra.mxu0 %v371_v4  ;;  %v362_v22 = vld [vmem:[%s1114_s6 + $0x18] sm:$0xff]  ;;  %v361_v24 = vld [vmem:[%s1114_s6 + $0x10] sm:$0xff]  ;;  %v360_v26 = vld [vmem:[%s1114_s6 + $0x8] sm:$0xff] }
  0x47   : > { %629 = vmatpush.msra.mxu3 %v419_v9  ;;  %424 = vmatpush.msra.mxu1 %v419_v9  ;;  %v412_v23 = vld [vmem:[%s1122_s15 + $0x30] sm:$0xff]  ;;  %v411_v25 = vld [vmem:[%s1122_s15 + $0x28] sm:$0xff]  ;;  %v410_v27 = vld [vmem:[%s1122_s15 + $0x20] sm:$0xff] }
  0x48   : > { %615 = vmatpush.msra.mxu2 %v370_v5  ;;  %383 = vmatpush.msra.mxu0 %v370_v5  ;;  %v359_v28 = vld [vmem:[%s1114_s6] sm:$0xff]  ;;  %v358_v29 = vld [vmem:[#allocation3 + $0x8] sm:$0xff]  ;;  %v357_v30 = vld [vmem:[#allocation3] sm:$0xff] }
  0x49   : > { %630 = vmatpush.msra.mxu3 %v418_v11  ;;  %425 = vmatpush.msra.mxu1 %v418_v11  ;;  %v409_v31 = vld [vmem:[%s1122_s15 + $0x18] sm:$0xff]  ;;  %v408_v32 = vld [vmem:[%s1122_s15 + $0x10] sm:$0xff]  ;;  %v407_v33 = vld [vmem:[%s1122_s15 + $0x8] sm:$0xff] }
  0x4a   : > { %616 = vmatpush.msra.mxu2 %v369_v8  ;;  %384 = vmatpush.msra.mxu0 %v369_v8  ;;  %v406_v34 = vld [vmem:[%s1122_s15] sm:$0xff]  ;;  %v732_v35 = vld [vmem:[%s306_s24] ss:$0 sm:$0xff] }
  0x4b   : > { %631 = vmatpush.msra.mxu3 %v417_v13  ;;  %426 = vmatpush.msra.mxu1 %v417_v13  ;;  %v404_v42 = vld [vmem:[#allocation2] sm:$0xff]  ;;  %v405_v45 = vld [vmem:[#allocation2 + $0x8] sm:$0xff] }
  0x4c   : > { %617 = vmatpush.msra.mxu2 %v368_v10  ;;  %385 = vmatpush.msra.mxu0 %v368_v10 }
  0x4d   : > { %632 = vmatpush.msra.mxu3 %v416_v15  ;;  %427 = vmatpush.msra.mxu1 %v416_v15 }
  0x4e   : > { %618 = vmatpush.msra.mxu2 %v367_v12  ;;  %386 = vmatpush.msra.mxu0 %v367_v12 }
  0x4f   : > { %633 = vmatpush.msra.mxu3 %v415_v17  ;;  %428 = vmatpush.msra.mxu1 %v415_v17 }
  0x50   : > { %619 = vmatpush.msra.mxu2 %v366_v14  ;;  %387 = vmatpush.msra.mxu0 %v366_v14 }
  0x51   : > { %634 = vmatpush.msra.mxu3 %v414_v19  ;;  %429 = vmatpush.msra.mxu1 %v414_v19 }
  0x52   : > { %620 = vmatpush.msra.mxu2 %v365_v16  ;;  %388 = vmatpush.msra.mxu0 %v365_v16 }
  0x53   : > { %635 = vmatpush.msra.mxu3 %v413_v21  ;;  %430 = vmatpush.msra.mxu1 %v413_v21 }
  0x54   : > { %621 = vmatpush.msra.mxu2 %v364_v18  ;;  %389 = vmatpush.msra.mxu0 %v364_v18 }
  0x55   : > { %636 = vmatpush.msra.mxu3 %v412_v23  ;;  %431 = vmatpush.msra.mxu1 %v412_v23 }
  0x56   : > { %622 = vmatpush.msra.mxu2 %v363_v20  ;;  %390 = vmatpush.msra.mxu0 %v363_v20 }
  0x57   : > { %637 = vmatpush.msra.mxu3 %v411_v25  ;;  %432 = vmatpush.msra.mxu1 %v411_v25 }
  0x58   : > { %623 = vmatpush.msra.mxu2 %v362_v22  ;;  %391 = vmatpush.msra.mxu0 %v362_v22 }
  0x59   : > { %638 = vmatpush.msra.mxu3 %v410_v27  ;;  %433 = vmatpush.msra.mxu1 %v410_v27 }
  0x5a   : > { %624 = vmatpush.msra.mxu2 %v361_v24  ;;  %392 = vmatpush.msra.mxu0 %v361_v24 }
  0x5b   : > { %639 = vmatpush.msra.mxu3 %v409_v31  ;;  %434 = vmatpush.msra.mxu1 %v409_v31 }
  0x5c   : > { %625 = vmatpush.msra.mxu2 %v360_v26  ;;  %393 = vmatpush.msra.mxu0 %v360_v26 }
  0x5d   : > { %640 = vmatpush.msra.mxu3 %v408_v32  ;;  %435 = vmatpush.msra.mxu1 %v408_v32 }
  0x5e   : > { %626 = vmatpush.msra.mxu2 %v359_v28  ;;  %394 = vmatpush.msra.mxu0 %v359_v28 }
  0x5f   : > { %398 = vmatmul.f32.vlgmr.msra.gmra.mxu2 %v358_v29  ;;  %395 = vmatmul.f32.vlgmr.msra.gmra.mxu0 %v357_v30 }
  0x60   : > { %641 = vmatpush.msra.mxu3 %v407_v33  ;;  %436 = vmatpush.msra.mxu1 %v407_v33 }
  0x62   : > { %642 = vmatpush.msra.mxu3 %v406_v34  ;;  %437 = vmatpush.msra.mxu1 %v406_v34 }
  0xdc   : > { %v396_v36 = vpop.f32.mrf.mxu0 }
  0xdd   : > { %v397_v37 = vadd.f32 %v732_v35, %v396_v36 }
  0xdf   : > { %v402_v38 = vmax.f32 %v397_v37, 0.0 }
  0xe1   : > { %438 = vmatmul.f32.vlgmr.msra.gmra.mxu1 %v402_v38 }
  0xe2   : > { %v399_v39 = vpop.f32.mrf.mxu2 }
  0xe3   : > { %v400_v40 = vadd.f32 %v732_v35, %v399_v39 }
  0xe5   : > { %v403_v41 = vmax.f32 %v400_v40, 0.0 }
  0xe7   : > { %441 = vmatmul.f32.vlgmr.msra.gmra.mxu3 %v403_v41 }
 0x15e   : > { %v439_v43 = vpop.f32.mrf.mxu1 }
 0x15f   : > { %v445_v44 = vadd.f32 %v439_v43, %v404_v42 }
 0x161   : > { %447 = vst [vmem:[#allocation2] sm:$0xff] %v445_v44 }
 0x169   : > { %452 = sbr.rel (%p605_p2) target bundleno = 376 (0x178), region = 64 }
 0x16a   : > { %v442_v46 = vpop.f32.mrf.mxu3 }
 0x16b   : > { %v446_v47 = vadd.f32 %v442_v46, %v405_v45 }
 0x16d   : > { %448 = vst [vmem:[#allocation2 + $0x8] sm:$0xff] %v446_v47 }
 0x16e   : > { %v453_v48 = vld [vmem:[#allocation2] sm:$0xff] }
 0x16f   : > { %v733_v49 = vld [vmem:[%s1193_s4] ss:$0 sm:$0xff] }
 0x170   : > { %v459_v51 = vadd.f32 %v733_v49, %v453_v48 }
 0x172   : > { %461 = vst [vmem:[#allocation11] sm:$0xff] %v459_v51 }
 0x174   : > { %v454_v50 = vld [vmem:[#allocation2 + $0x8] sm:$0xff] }
 0x175   : > { %v460_v52 = vadd.f32 %v733_v49, %v454_v50 }
 0x177   : > { %462 = vst [vmem:[#allocation11 + $0x8] sm:$0xff] %v460_v52 }
 0x178 PF: > { %p674_p3 = scmp.eq.s32.totalorder %s1056_s27, 3  ;;  %s473_s9 = sshll.u32 %s1194_s5, 4  ;;  %s474_s9 = int_to_ptr.hbm [resolvable:$true] %s473_s9 }
 0x179   : > { %s951_s10 = smov [#allocation11]   ;;  %s952_s16 = smov 128  }
 0x17a   : > { %s471_s21 = sshll.u32 %s951_s10, 4  ;;  %s953_s28 = smov 8   ;;  %s472_s21 = int_to_ptr.vmem [resolvable:$true] %s471_s21 }
 0x17b   : > { %654 = dma.vmem_to_hbm [thread:$0]  (%p674_p3), %s472_s21, 256, %s474_s9, [#allocation5], %s952_s16, %s952_s16, %s953_s28  }
 0x17c   : > { %919 = dma.done.wait (%p674_p3), [#allocation5], 256  }
 0x17d   : > { %921 = vsyncadd (%p674_p3), [#allocation5], 4294967040 }
 0x17e PF: > { %s23_s23 = sadd.s32 1, %s944_s23   ;;  %s1207_s27 = sld [smem:[#allocation16_spill]] }
 0x17f   : > { %p20_p4 = scmp.ge.s32.totalorder %s23_s23, 6   ;;  %s1208_s18 = smov %s928_s19 }
 0x180   : > { %s1209_s19 = smov %s932_s20  ;;  %s1210_s20 = smov %s1033_s30 }
 0x181   : > { %s1211_s21 = smov %s940_s22  ;;  %22 = sbr.rel (!%p20_p4) target bundleno = 12 (0xc), region = 116 }
 0x184   : > { %s1212_s22 = smov %s1207_s27 }
 0x186   :  { %490 = vsyncpa [#allocation4], 1 }
 0x187   :  { %492 = vsyncpa [#allocation4 + $0x1], 1 }
 0x188   :  { %493 = vsyncpa [#allocation7], 1 }
 0x189   :  { %495 = vsyncpa [#allocation7 + $0x1], 1 }
 0x18a   :  { %496 = vsyncpa [#allocation10], 1 }
 0x18b   :  { %498 = vsyncpa [#allocation10 + $0x1], 1 }
 0x18c   :  { %499 = vsyncpa [#allocation5], 1 }
 0x18d   :  { %501 = vsyncpa [#allocation5 + $0x1], 1 }

</bundles_post_ra>
